<compile_context>
chip_gen: v7x
topology: tpu7x:2x2x1
jax: 0.10.0
libtpu: 0.0.40
codegen_flags: <defaults>
</compile_context>

<pallas_src>
import jax
import jax.numpy as jnp
from jax.experimental import pallas as pl
from jax.experimental.pallas import tpu as pltpu

_SUBLANE = 8      # f32 sublane width (x and out stay f32 in HBM)
_MIN_STEPS = 4    # target minimum grid steps for large batches (v7x megacore)


def _round_up(x, m):
    return ((x + m - 1) // m) * m


def _mlp_kernel(x_ref, w1_ref, b1_ref, w2_ref, b2_ref, w3_ref, b3_ref, o_ref):
    # x tile: (TM, input_dim) f32 -> cast to bf16 in-kernel (free under DMA).
    x = x_ref[...].astype(jnp.bfloat16)

    h1 = jnp.dot(x, w1_ref[...], preferred_element_type=jnp.float32)
    h1 = jnp.maximum(h1 + b1_ref[...], 0.0)           # bias + ReLU in f32 (Dropout == id)

    h2 = jnp.dot(h1.astype(jnp.bfloat16), w2_ref[...],
                 preferred_element_type=jnp.float32)
    h2 = jnp.maximum(h2 + b2_ref[...], 0.0)           # bias + ReLU in f32 (Dropout == id)

    out = jnp.dot(h2.astype(jnp.bfloat16), w3_ref[...],
                  preferred_element_type=jnp.float32)
    o_ref[...] = (out + b3_ref[...]).astype(o_ref.dtype)


def prepare_params(params):
    """One-time weight prep (cache and reuse across calls): weights -> bf16 for
    the MXU, biases -> f32 row vectors. No padding needed anymore."""
    f32, bf16 = jnp.float32, jnp.bfloat16
    return {
        "w1": params["w1"].astype(bf16),
        "b1": params["b1"].astype(f32).reshape(1, -1),
        "w2": params["w2"].astype(bf16),
        "b2": params["b2"].astype(f32).reshape(1, -1),
        "w3": params["w3"].astype(bf16),
        "b3": params["b3"].astype(f32).reshape(1, -1),
    }


def mlp_forward(x, prepared, *, block_rows=4096):
    """x: (B, input_dim) float32; prepared: output of prepare_params().

    Returns (B, output_dim) float32 logits (eval-mode forward).
    NOTE: matmuls run bf16 on the MXU with f32 accumulation (not bit-identical
    to PyTorch f32 Linear, but well within 1e-3 at these layer sizes).
    """
    w1, b1 = prepared["w1"], prepared["b1"]
    w2, b2 = prepared["w2"], prepared["b2"]
    w3, b3 = prepared["w3"], prepared["b3"]

    B, input_dim = x.shape
    h1_dim = w1.shape[1]                    # 32
    h2_dim = w2.shape[1]                    # 16
    out_dim = w3.shape[1]

    # --- batch tiling ---------------------------------------------------------
    # tm: multiple of 8 sublanes (x/out are f32), capped at block_rows, and for
    # large B also capped so the grid has >= _MIN_STEPS steps (keeps both v7x
    # TensorCores fed and preserves prefetch/writeback overlap).
    tm = min(block_rows, _round_up(B, _SUBLANE))
    if B >= _MIN_STEPS * _SUBLANE:
        tm = min(tm, _round_up(-(-B // _MIN_STEPS), _SUBLANE))
    tm = max(tm, _SUBLANE)

    b_pad = _round_up(B, tm)
    x_in = x
    if b_pad != B:                          # rare path; no-op when B % tm == 0
        x_in = jnp.pad(x, ((0, b_pad - B), (0, 0)))
    grid = (b_pad // tm,)

    # --- cost / VMEM hints ----------------------------------------------------
    flops = 2 * b_pad * (input_dim * h1_dim + h1_dim * h2_dim + h2_dim * out_dim)
    weight_bytes = ((input_dim * h1_dim + h1_dim * h2_dim + h2_dim * out_dim) * 2
                    + (h1_dim + h2_dim + out_dim) * 4)
    bytes_accessed = b_pad * input_dim * 4 + weight_bytes + b_pad * out_dim * 4
    cost = pl.CostEstimate(flops=flops, transcendentals=0,
                           bytes_accessed=bytes_accessed)

    # Double-buffered x/out tiles + resident weights + headroom; cap at 32 MiB
    # so the budget is safe even on v7x (64 MiB physical / 32 MiB scoped VMEM).
    per_tile = tm * input_dim * 4 + tm * out_dim * 4
    vmem_limit = int(min(2 * per_tile + 2 * weight_bytes + (4 << 20), 32 << 20))

    out = pl.pallas_call(
        _mlp_kernel,
        out_shape=jax.ShapeDtypeStruct((b_pad, out_dim), jnp.float32),
        grid=grid,
        in_specs=[
            # x tile; if a profile on v5e shows exposed DMA, consider
            # pipeline_mode=pl.Buffered(3) here.
            pl.BlockSpec((tm, input_dim), lambda i: (i, 0)),
            pl.BlockSpec((input_dim, h1_dim), lambda i: (0, 0)),    # w1 (resident)
            pl.BlockSpec((1, h1_dim), lambda i: (0, 0)),            # b1
            pl.BlockSpec((h1_dim, h2_dim), lambda i: (0, 0)),       # w2
            pl.BlockSpec((1, h2_dim), lambda i: (0, 0)),            # b2
            pl.BlockSpec((h2_dim, out_dim), lambda i: (0, 0)),      # w3 (true width)
            pl.BlockSpec((1, out_dim), lambda i: (0, 0)),           # b3
        ],
        # Narrow output block: last dim == full array dim (legal); masked vst
        # but ~16x less HBM writeback than a 128-lane padded f32 output.
        out_specs=pl.BlockSpec((tm, out_dim), lambda i: (i, 0)),
        compiler_params=pltpu.CompilerParams(
            dimension_semantics=("parallel",),
            vmem_limit_bytes=vmem_limit,
        ),
        cost_estimate=cost,
    )(x_in, w1, b1, w2, b2, w3, b3)

    return out if b_pad == B else out[:B]


def init_params(key, input_dim, output_dim):
    """Deterministic init mimicking PyTorch nn.Linear default:
    U(-1/sqrt(fan_in), 1/sqrt(fan_in)) for both weights and biases.
    Weights stored as (in_features, out_features) so y = x @ W + b."""
    dims = [(input_dim, 32), (32, 16), (16, output_dim)]
    params = {}
    for idx, (fan_in, fan_out) in enumerate(dims, start=1):
        key, kw, kb = jax.random.split(key, 3)
        bound = 1.0 / (fan_in ** 0.5)
        params[f"w{idx}"] = jax.random.uniform(
            kw, (fan_in, fan_out), jnp.float32, minval=-bound, maxval=bound)
        params[f"b{idx}"] = jax.random.uniform(
            kb, (1, fan_out), jnp.float32, minval=-bound, maxval=bound)
    return params


def mlp_reference(x, params):
    """Pure-JAX reference mirroring the kernel's bf16-matmul / f32-accumulate."""
    bf16, f32 = jnp.bfloat16, jnp.float32
    h1 = jnp.dot(x.astype(bf16), params["w1"].astype(bf16),
                 preferred_element_type=f32) + params["b1"]
    h1 = jnp.maximum(h1, 0.0)
    h2 = jnp.dot(h1.astype(bf16), params["w2"].astype(bf16),
                 preferred_element_type=f32) + params["b2"]
    h2 = jnp.maximum(h2, 0.0)
    return jnp.dot(h2.astype(bf16), params["w3"].astype(bf16),
                   preferred_element_type=f32) + params["b3"]


if __name__ == "__main__":
    key = jax.random.PRNGKey(0)
    k_x, k_p = jax.random.split(key)

    batch, input_dim, output_dim = 8, 32, 8
    x = jax.random.normal(k_x, (batch, input_dim), jnp.float32)
    params = init_params(k_p, input_dim, output_dim)

    prepared = prepare_params(params)        # hoisted weight prep (cacheable)
    out = mlp_forward(x, prepared)
    jax.block_until_ready(out)

    ref = mlp_reference(x, params)
    assert out.shape == (batch, output_dim)
    assert jnp.allclose(out, ref, atol=1e-3, rtol=1e-3), (
        f"max abs err {jnp.max(jnp.abs(out - ref))}")

    print("KERNEL_OK")
</pallas_src>

<mosaic_0001>
module attributes {stable_mosaic.version = 11 : i64} {
  func.func @_mlp_kernel(%arg0: i32, %arg1: memref<8x32xf32, #tpu.memory_space<vmem>>, %arg2: memref<32x32xbf16, #tpu.memory_space<vmem>>, %arg3: memref<1x32xf32, #tpu.memory_space<vmem>>, %arg4: memref<32x16xbf16, #tpu.memory_space<vmem>>, %arg5: memref<1x16xf32, #tpu.memory_space<vmem>>, %arg6: memref<16x8xbf16, #tpu.memory_space<vmem>>, %arg7: memref<1x8xf32, #tpu.memory_space<vmem>>, %arg8: memref<8x8xf32, #tpu.memory_space<vmem>>) attributes {dimension_semantics = [#tpu.dimension_semantics<parallel>], iteration_bounds = array<i64: 1>, scalar_prefetch = 0 : i64, scratch_operands = 0 : i64, tpu.core_type = #tpu.core_type<tc>, window_params = [{transform_indices = @transform_0, window_bounds = array<i64: 8, 32>}, {pipeline_mode = #tpu.pipeline_mode<synchronous>, transform_indices = @transform_1, window_bounds = array<i64: 32, 32>}, {pipeline_mode = #tpu.pipeline_mode<synchronous>, transform_indices = @transform_2, window_bounds = array<i64: 1, 32>}, {pipeline_mode = #tpu.pipeline_mode<synchronous>, transform_indices = @transform_3, window_bounds = array<i64: 32, 16>}, {pipeline_mode = #tpu.pipeline_mode<synchronous>, transform_indices = @transform_4, window_bounds = array<i64: 1, 16>}, {pipeline_mode = #tpu.pipeline_mode<synchronous>, transform_indices = @transform_5, window_bounds = array<i64: 16, 8>}, {pipeline_mode = #tpu.pipeline_mode<synchronous>, transform_indices = @transform_6, window_bounds = array<i64: 1, 8>}, {transform_indices = @transform_7, window_bounds = array<i64: 8, 8>}]} {
    %c0 = arith.constant 0 : index
    %c0_0 = arith.constant 0 : index
    %0 = vector.load %arg1[%c0, %c0_0] : memref<8x32xf32, #tpu.memory_space<vmem>>, vector<8x32xf32>
    %1 = arith.truncf %0 : vector<8x32xf32> to vector<8x32xbf16>
    %c0_1 = arith.constant 0 : index
    %c0_2 = arith.constant 0 : index
    %2 = vector.load %arg2[%c0_1, %c0_2] : memref<32x32xbf16, #tpu.memory_space<vmem>>, vector<32x32xbf16>
    %cst = arith.constant dense<0.000000e+00> : vector<8x32xf32>
    %3 = tpu.matmul %1, %2, %cst {dimension_numbers = #tpu.dot_dimension_numbers<[1], [0], [0], [1], [0, 0, 1, 1], [], []>} : vector<8x32xbf16>, vector<32x32xbf16>, vector<8x32xf32> -> vector<8x32xf32>
    %c0_3 = arith.constant 0 : index
    %c0_4 = arith.constant 0 : index
    %4 = vector.load %arg3[%c0_3, %c0_4] : memref<1x32xf32, #tpu.memory_space<vmem>>, vector<1x32xf32>
    %5 = vector.broadcast %4 : vector<1x32xf32> to vector<8x32xf32>
    %6 = arith.addf %3, %5 : vector<8x32xf32>
    %cst_5 = arith.constant 0.000000e+00 : f32
    %7 = vector.broadcast %cst_5 : f32 to vector<8x32xf32>
    %8 = arith.maximumf %6, %7 : vector<8x32xf32>
    %9 = arith.truncf %8 : vector<8x32xf32> to vector<8x32xbf16>
    %c0_6 = arith.constant 0 : index
    %c0_7 = arith.constant 0 : index
    %10 = vector.load %arg4[%c0_6, %c0_7] : memref<32x16xbf16, #tpu.memory_space<vmem>>, vector<32x16xbf16>
    %cst_8 = arith.constant dense<0.000000e+00> : vector<8x16xf32>
    %11 = tpu.matmul %9, %10, %cst_8 {dimension_numbers = #tpu.dot_dimension_numbers<[1], [0], [0], [1], [0, 0, 1, 1], [], []>} : vector<8x32xbf16>, vector<32x16xbf16>, vector<8x16xf32> -> vector<8x16xf32>
    %c0_9 = arith.constant 0 : index
    %c0_10 = arith.constant 0 : index
    %12 = vector.load %arg5[%c0_9, %c0_10] : memref<1x16xf32, #tpu.memory_space<vmem>>, vector<1x16xf32>
    %13 = vector.broadcast %12 : vector<1x16xf32> to vector<8x16xf32>
    %14 = arith.addf %11, %13 : vector<8x16xf32>
    %cst_11 = arith.constant 0.000000e+00 : f32
    %15 = vector.broadcast %cst_11 : f32 to vector<8x16xf32>
    %16 = arith.maximumf %14, %15 : vector<8x16xf32>
    %17 = arith.truncf %16 : vector<8x16xf32> to vector<8x16xbf16>
    %c0_12 = arith.constant 0 : index
    %c0_13 = arith.constant 0 : index
    %18 = vector.load %arg6[%c0_12, %c0_13] : memref<16x8xbf16, #tpu.memory_space<vmem>>, vector<16x8xbf16>
    %cst_14 = arith.constant dense<0.000000e+00> : vector<8x8xf32>
    %19 = tpu.matmul %17, %18, %cst_14 {dimension_numbers = #tpu.dot_dimension_numbers<[1], [0], [0], [1], [0, 0, 1, 1], [], []>} : vector<8x16xbf16>, vector<16x8xbf16>, vector<8x8xf32> -> vector<8x8xf32>
    %c0_15 = arith.constant 0 : index
    %c0_16 = arith.constant 0 : index
    %20 = vector.load %arg7[%c0_15, %c0_16] : memref<1x8xf32, #tpu.memory_space<vmem>>, vector<1x8xf32>
    %21 = vector.broadcast %20 : vector<1x8xf32> to vector<8x8xf32>
    %22 = arith.addf %19, %21 : vector<8x8xf32>
    %c0_17 = arith.constant 0 : index
    %c0_18 = arith.constant 0 : index
    %23 = vector.load %arg8[%c0_17, %c0_18] : memref<8x8xf32, #tpu.memory_space<vmem>>, vector<8x8xf32>
    tpu.vector_store %arg8[%c0_17, %c0_18], %22 {strides = array<i32>} : memref<8x8xf32, #tpu.memory_space<vmem>>, vector<8x8xf32>,
    return
  }
  func.func @transform_0(%arg0: i32) -> (i32, i32) {
    %c0_i32 = arith.constant 0 : i32
    %c0_i32_0 = arith.constant 0 : i32
    return %arg0, %c0_i32 : i32, i32
  }
  func.func @transform_1(%arg0: i32) -> (i32, i32) {
    %c0_i32 = arith.constant 0 : i32
    %c0_i32_0 = arith.constant 0 : i32
    %c0_i32_1 = arith.constant 0 : i32
    return %c0_i32, %c0_i32_0 : i32, i32
  }
  func.func @transform_2(%arg0: i32) -> (i32, i32) {
    %c0_i32 = arith.constant 0 : i32
    %c0_i32_0 = arith.constant 0 : i32
    %c0_i32_1 = arith.constant 0 : i32
    return %c0_i32, %c0_i32_0 : i32, i32
  }
  func.func @transform_3(%arg0: i32) -> (i32, i32) {
    %c0_i32 = arith.constant 0 : i32
    %c0_i32_0 = arith.constant 0 : i32
    %c0_i32_1 = arith.constant 0 : i32
    return %c0_i32, %c0_i32_0 : i32, i32
  }
  func.func @transform_4(%arg0: i32) -> (i32, i32) {
    %c0_i32 = arith.constant 0 : i32
    %c0_i32_0 = arith.constant 0 : i32
    %c0_i32_1 = arith.constant 0 : i32
    return %c0_i32, %c0_i32_0 : i32, i32
  }
  func.func @transform_5(%arg0: i32) -> (i32, i32) {
    %c0_i32 = arith.constant 0 : i32
    %c0_i32_0 = arith.constant 0 : i32
    %c0_i32_1 = arith.constant 0 : i32
    return %c0_i32, %c0_i32_0 : i32, i32
  }
  func.func @transform_6(%arg0: i32) -> (i32, i32) {
    %c0_i32 = arith.constant 0 : i32
    %c0_i32_0 = arith.constant 0 : i32
    %c0_i32_1 = arith.constant 0 : i32
    return %c0_i32, %c0_i32_0 : i32, i32
  }
  func.func @transform_7(%arg0: i32) -> (i32, i32) {
    %c0_i32 = arith.constant 0 : i32
    %c0_i32_0 = arith.constant 0 : i32
    return %arg0, %c0_i32 : i32, i32
  }
}

</mosaic_0001>

<bundles_post_ra>
// kernel: tpu_custom_call.1
= control target key start
LH: loop header
LB: loop body
LE: loop exit
PB: predicated region body
PF: predicated region fallthrough
CT: control target
= control target key end

     0   :  { %v315_v1 = vmov 0.0   ;;  %vm316_vm0 = vmmov 0   ;;  %s399_s0 = inlined_call_operand.vmem [shape: f32[8,32], index: 0, kind: input, shape index: {}]   ;;  %s400_s1 = inlined_call_operand.vmem [shape: bf16[32,32], index: 1, kind: input, shape index: {}]   ;;  %s401_s2 = inlined_call_operand.vmem [shape: f32[1,32], index: 2, kind: input, shape index: {}]   ;;  %s402_s3 = inlined_call_operand.vmem [shape: bf16[32,16], index: 3, kind: input, shape index: {}]   ;;  %s403_s4 = inlined_call_operand.vmem [shape: f32[1,16], index: 4, kind: input, shape index: {}]   ;;  %s404_s5 = inlined_call_operand.vmem [shape: bf16[16,8], index: 5, kind: input, shape index: {}]   ;;  %s405_s6 = inlined_call_operand.vmem [shape: f32[1,8], index: 6, kind: input, shape index: {}]   ;;  %s406_s7 = inlined_call_operand.hbm [shape: f32[8,8], index: 7, kind: output, shape index: {}]  }
   0x1   :  { %v286_v0 = vld [vmem:[%s400_s1] sm:$0xff]   ;;  %261 = vmatprep.subr.bf16.mxu0 %v315_v1  ;;  %269 = vmatprep.subr.bf16.mxu1 %v315_v1  ;;  %v287_v2 = vld [vmem:[%s400_s1 + $0x8] sm:$0xff]  }
   0x2   :  { %262 = vmatpush3.bf16.msra.mxu0 %v286_v0  ;;  %265 = vmatprep.mubr.msk.bf16.mxu0 %vm316_vm0, %v315_v1  ;;  %v28_v3 = vld [vmem:[%s399_s0] sm:$0xff] }
   0x3   :  { %263 = vmatprep.subr.bf16.mxu0 %v315_v1  ;;  %273 = vmatprep.mubr.msk.bf16.mxu1 %vm316_vm0, %v315_v1 }
   0x4   :  { %12 = vsyncpa [#allocation3], 0  ;;  %v29_v4 = vpack.c.bf16 %v28_v3, %v28_v3  ;;  %vm53_vm1 = vcmask 261120   ;;  %v288_v5 = vld [vmem:[%s402_s3] sm:$0xff]   ;;  %v289_v6 = vld [vmem:[%s402_s3 + $0x8] sm:$0xff]   ;;  %vm182_vm2 = vcmask 130048  }
   0x5   :  { %270 = vmatpush3.bf16.msra.mxu1 %v288_v5  ;;  %v290_v7 = vld [vmem:[%s404_s5] sm:$0xff]   ;;  %s317_s14 = smov [#allocation2]   ;;  %vm226_vm3 = vcmask 64512  }
   0x6   :  { %264 = vmatpush3.bf16.msra.mxu0 %v287_v2  ;;  %271 = vmatprep.subr.bf16.mxu1 %v315_v1  ;;  %v242_v8 = vld [vmem:[%s401_s2] ss:$0 sm:$0xff]  ;;  %s234_s15 = sshll.u32 %s317_s14, 4  ;;  %s235_s15 = int_to_ptr.vmem [resolvable:$true] %s234_s15 }
   0x7   :  { %277 = vmatprep.subr.bf16.mxu0 %v315_v1  ;;  %v246_v16 = vld [vmem:[%s403_s4] ss:$0 sm:$0xff]  ;;  %s291_s4 = scalar_lea.vmem %s235_s15, 128  ;;  %p296_p1 = scmp.lt.s32.totalorder %s235_s15, %s235_s15 }
   0x8   :  { %v250_v24 = vld [vmem:[%s405_s6] ss:$0 sm:$0xff]  ;;  %p292_p0 = scmp.ne.s32.totalorder %s235_s15, %s291_s4  ;;  %p297_p2 = scmp.lt.s32.totalorder %s291_s4, %s291_s4 }
   0x9   :  { %266 = vmatmul.mubr.msk.bf16.vlgmr.msra.gmra.mrb[0].mxu0 %vm53_vm1, %v29_v4  ;;  %272 = vmatpush3.bf16.msra.mxu1 %v289_v6 }
   0xa   :  { %279 = vmatprep.mubr.msk.bf16.mxu0 %vm316_vm0, %v315_v1  ;;  %278 = vmatpush3.bf16.msra.mxu0 %v290_v7  ;;  %p298_p3 = por %p297_p2, %p296_p1 }
   0xc   :  { %p299_p4 = pnand %p298_p3, %p292_p0 }
  0xdc   :  { %v91_v9 = vpop.f32.mrb[0].mxu0 }
  0xdd   :  { %v92_v10 = vadd.f32 %v242_v8, %v91_v9  ;;  %v267_v11 = vpop.f32.mrb[1].mxu0 }
  0xde   :  { %v94_v12 = vpop.f32.mrb[2].mxu0 }
  0xdf   :  { %v97_v13 = vmax.f32 %v92_v10, 0.0  ;;  %v268_v14 = vpop.f32.mrb[3].mxu0 }
  0xe1   :  { %v98_v15 = vpack.c.bf16 %v97_v13, %v97_v13 }
  0xe3   :  { %274 = vmatmul.mubr.msk.bf16.vlgmr.msra.gmra.mrb[0].mxu1 %vm53_vm1, %v98_v15 }
 0x1b6   :  { %v159_v17 = vpop.f32.mrb[0].mxu1 }
 0x1b7   :  { %v160_v18 = vadd.f32 %v246_v16, %v159_v17  ;;  %v275_v19 = vpop.f32.mrb[1].mxu1 }
 0x1b8   :  { %v162_v20 = vpop.f32.mrb[2].mxu1 }
 0x1b9   :  { %v165_v21 = vmax.f32 %v160_v18, 0.0  ;;  %v276_v22 = vpop.f32.mrb[3].mxu1 }
 0x1bb   :  { %v166_v23 = vpack.c.bf16 %v165_v21, %v165_v21 }
 0x1bd   :  { %280 = vmatmul.mubr.msk.bf16.vlgmr.msra.gmra.mrb[4].mxu0 %vm182_vm2, %v166_v23 }
 0x290   :  { %v220_v25 = vpop.f32.mrb[4].mxu0 }
 0x291   :  { %v221_v26 = vadd.f32 %v250_v24, %v220_v25  ;;  %v281_v27 = vpop.f32.mrb[5].mxu0 }
 0x292   :  { %v223_v28 = vpop.f32.mrb[6].mxu0 }
 0x293   :  { %v282_v29 = vpop.f32.mrb[7].mxu0  ;;  %227 = vst.msk [vmem:[#allocation2] sm:$0xff] %vm226_vm3, %v221_v26 }
 0x294   :  { %302 = shalt.err (!%p299_p4)
}
 0x295   :  { %s303_s6 = scalar_lea.hbm %s406_s7, 128 }
 0x296   :  { %p304_p5 = scmp.ne.s32.totalorder %s406_s7, %s303_s6  ;;  %p307_p6 = scmp.lt.u32.totalorder %s303_s6, %s406_s7 }
 0x298   :  { %p309_p7 = pnand %p307_p6, %p304_p5 }
 0x29a   :  { %312 = shalt.err (!%p309_p7)
}
 0x29b   :  { %237 = dma.vmem_to_hbm [thread:$0]  %s235_s15, 128, %s406_s7, [#allocation3]  }
 0x29c   :  { %313 = dma.done.wait [#allocation3], 128  }
 0x29d   :  { %314 = vsyncadd [#allocation3], 4294967168 }
 0x29e   :  { %241 = vsyncpa [#allocation3], 1 }

</bundles_post_ra>
